<compile_context>
chip_gen: v7x
topology: tpu7x:2x2x1
jax: 0.10.0
libtpu: 0.0.40
codegen_flags: <defaults>
</compile_context>

<pallas_src>
import jax
import jax.numpy as jnp
from jax.experimental import pallas as pl
from jax.experimental.pallas import tpu as pltpu

_LANE = 128


def _pruned_final_mapping_kernel(res_ref, w_ref, out_ref):
    """out = res @ W_masked — pure MXU matmul, mask already folded into W."""
    out_ref[...] = jnp.dot(
        res_ref[...], w_ref[...], preferred_element_type=jnp.float32
    ).astype(out_ref.dtype)


def pruned_final_mapping(res, pruning_mask, weight_t, *, tile_b=8192,
                         compute_dtype=jnp.bfloat16):
    """
    res:          (B, n_d)    float32
    pruning_mask: (n_d,)      float32 (frozen, binary)
    weight_t:     (n_d, out)  float32 (torch Linear weight, pre-transposed)
    returns:      (B, out)    float32
    """
    B, n_d = res.shape
    out_dim = weight_t.shape[1]

    # Fold the frozen pruning mask into the weight (done once, outside kernel).
    w_masked = pruning_mask.astype(jnp.float32)[:, None] * weight_t.astype(jnp.float32)

    # Lane-dense output: pad output dim to a multiple of 128 lanes (zeros in the
    # weight columns), slice the padding off after the call.
    out_pad = -(-out_dim // _LANE) * _LANE
    if out_pad != out_dim:
        w_masked = jnp.pad(w_masked, ((0, 0), (0, out_pad - out_dim)))

    # bf16 inputs halve HBM traffic on the dominant `res` stream; accumulation
    # stays f32 on the MXU. Pass compute_dtype=jnp.float32 for exact semantics.
    res_c = res.astype(compute_dtype)
    w_c = w_masked.astype(compute_dtype)

    # Batch tiling (block rows must be a multiple of 8 or the full dim).
    tile_b = min(tile_b, B)
    grid_b = pl.cdiv(B, tile_b)

    cost = pl.CostEstimate(
        flops=2 * B * n_d * out_dim,
        transcendentals=0,
        bytes_accessed=(res_c.size * res_c.dtype.itemsize
                        + w_c.size * w_c.dtype.itemsize
                        + B * out_pad * 4),
    )

    out_padded = pl.pallas_call(
        _pruned_final_mapping_kernel,
        out_shape=jax.ShapeDtypeStruct((B, out_pad), jnp.float32),
        grid_spec=pl.GridSpec(
            grid=(grid_b,),
            in_specs=[
                pl.BlockSpec((tile_b, n_d), lambda i: (i, 0)),      # res: streamed
                pl.BlockSpec((n_d, out_pad), lambda i: (0, 0)),     # W: VMEM-resident
            ],
            out_specs=pl.BlockSpec((tile_b, out_pad), lambda i: (i, 0)),
        ),
        compiler_params=pltpu.CompilerParams(
            dimension_semantics=("parallel",),                      # 2x on v7x (2 TCs)
        ),
        cost_estimate=cost,
    )(res_c, w_c)

    return out_padded[:, :out_dim] if out_pad != out_dim else out_padded


if __name__ == "__main__":
    # Small shapes consistent with a TabNet decision output:
    #   batch=8, n_d=32 (decision dim), output_dim=16.
    B, N_D, OUT = 8, 32, 16

    key = jax.random.PRNGKey(0)
    k_res, k_w, k_mask = jax.random.split(key, 3)

    res = jax.random.normal(k_res, (B, N_D), dtype=jnp.float32)
    # nn.Linear(n_d, output_dim, bias=False): weight is (OUT, N_D); store transposed.
    weight = jax.random.normal(k_w, (OUT, N_D), dtype=jnp.float32) * (1.0 / jnp.sqrt(N_D))
    weight_t = weight.T
    # Binary pruning mask over the n_d features (frozen parameter in torch).
    pruning_mask = (jax.random.uniform(k_mask, (N_D,)) > 0.3).astype(jnp.float32)

    # Pure-JAX reference of the exact torch forward: (res * mask) @ W.T
    ref = (res * pruning_mask[None, :]) @ weight.T

    # Exact-semantics path (f32 compute) — tight check against the reference.
    out_f32 = pruned_final_mapping(res, pruning_mask, weight_t,
                                   compute_dtype=jnp.float32)
    out_f32 = jax.block_until_ready(out_f32)
    assert out_f32.shape == (B, OUT)
    assert jnp.allclose(out_f32, ref, atol=1e-5, rtol=1e-5), "f32 mismatch vs reference"

    # Default perf path (bf16 inputs, f32 accumulation) — looser tolerance.
    out_bf16 = pruned_final_mapping(res, pruning_mask, weight_t)
    out_bf16 = jax.block_until_ready(out_bf16)
    assert out_bf16.shape == (B, OUT)
    assert jnp.allclose(out_bf16, ref, atol=5e-2, rtol=5e-2), "bf16 mismatch vs reference"

    print("KERNEL_OK")
</pallas_src>

<mosaic_0001>
module attributes {stable_mosaic.version = 11 : i64} {
  func.func @_pruned_final_mapping_kernel(%arg0: i32, %arg1: memref<8x32xf32, #tpu.memory_space<vmem>>, %arg2: memref<32x128xf32, #tpu.memory_space<vmem>>, %arg3: memref<8x128xf32, #tpu.memory_space<vmem>>) attributes {dimension_semantics = [#tpu.dimension_semantics<parallel>], iteration_bounds = array<i64: 1>, scalar_prefetch = 0 : i64, scratch_operands = 0 : i64, tpu.core_type = #tpu.core_type<tc>, window_params = [{transform_indices = @transform_0, window_bounds = array<i64: 8, 32>}, {pipeline_mode = #tpu.pipeline_mode<synchronous>, transform_indices = @transform_1, window_bounds = array<i64: 32, 128>}, {transform_indices = @transform_2, window_bounds = array<i64: 8, 128>}]} {
    %c0 = arith.constant 0 : index
    %c0_0 = arith.constant 0 : index
    %0 = vector.load %arg1[%c0, %c0_0] : memref<8x32xf32, #tpu.memory_space<vmem>>, vector<8x32xf32>
    %c0_1 = arith.constant 0 : index
    %c0_2 = arith.constant 0 : index
    %1 = vector.load %arg2[%c0_1, %c0_2] : memref<32x128xf32, #tpu.memory_space<vmem>>, vector<32x128xf32>
    %cst = arith.constant dense<0.000000e+00> : vector<8x128xf32>
    %2 = tpu.matmul %0, %1, %cst {dimension_numbers = #tpu.dot_dimension_numbers<[1], [0], [0], [1], [0, 0, 1, 1], [], []>} : vector<8x32xf32>, vector<32x128xf32>, vector<8x128xf32> -> vector<8x128xf32>
    %c0_3 = arith.constant 0 : index
    %c0_4 = arith.constant 0 : index
    %3 = vector.load %arg3[%c0_3, %c0_4] : memref<8x128xf32, #tpu.memory_space<vmem>>, vector<8x128xf32>
    tpu.vector_store %arg3[%c0_3, %c0_4], %2 {strides = array<i32>} : memref<8x128xf32, #tpu.memory_space<vmem>>, vector<8x128xf32>,
    return
  }
  func.func @transform_0(%arg0: i32) -> (i32, i32) {
    %c0_i32 = arith.constant 0 : i32
    %c0_i32_0 = arith.constant 0 : i32
    return %arg0, %c0_i32 : i32, i32
  }
  func.func @transform_1(%arg0: i32) -> (i32, i32) {
    %c0_i32 = arith.constant 0 : i32
    %c0_i32_0 = arith.constant 0 : i32
    %c0_i32_1 = arith.constant 0 : i32
    return %c0_i32, %c0_i32_0 : i32, i32
  }
  func.func @transform_2(%arg0: i32) -> (i32, i32) {
    %c0_i32 = arith.constant 0 : i32
    %c0_i32_0 = arith.constant 0 : i32
    return %arg0, %c0_i32 : i32, i32
  }
}

</mosaic_0001>

<bundles_post_ra>
// kernel: tpu_custom_call.1
= control target key start
LH: loop header
LB: loop body
LE: loop exit
PB: predicated region body
PF: predicated region fallthrough
CT: control target
= control target key end

     0   :  { %7 = vsyncpa [#allocation3], 0  ;;  %s303_s0 = inlined_call_operand.hbm [shape: f32[8,32], index: 0, kind: input, shape index: {}]   ;;  %s304_s1 = inlined_call_operand.hbm [shape: f32[32,128], index: 1, kind: input, shape index: {}]   ;;  %s305_s2 = inlined_call_operand.hbm [shape: f32[8,128], index: 2, kind: output, shape index: {}]  }
   0x1   :  { %8 = vsyncpa [#allocation6], 0 }
   0x2   :  { %9 = vsyncpa [#allocation4], 0  ;;  %s237_s9 = smov [#allocation2]   ;;  %s238_s11 = smov [#allocation5]  }
   0x3   :  { %s16_s10 = sshll.u32 %s237_s9, 4  ;;  %s25_s12 = sshll.u32 %s238_s11, 4  ;;  %s17_s10 = int_to_ptr.vmem [resolvable:$true] %s16_s10  ;;  %s260_s12 = int_to_ptr.vmem [resolvable:$true] %s25_s12 }
   0x4   :  { %s165_s15 = scalar_lea.hbm %s303_s0, 128 }
   0x5   :  { %p166_p0 = scmp.ne.s32.totalorder %s303_s0, %s165_s15  ;;  %p169_p1 = scmp.lt.u32.totalorder %s165_s15, %s303_s0 }
   0x7   :  { %p171_p2 = pnand %p169_p1, %p166_p0 }
   0x9   :  { %174 = shalt.err (!%p171_p2)
}
   0xa   :  { %s175_s20 = scalar_lea.vmem %s17_s10, 128  ;;  %p180_p4 = scmp.lt.s32.totalorder %s17_s10, %s17_s10 }
   0xb   :  { %p176_p3 = scmp.ne.s32.totalorder %s17_s10, %s175_s20  ;;  %p181_p5 = scmp.lt.s32.totalorder %s175_s20, %s175_s20 }
   0xd   :  { %p182_p6 = por %p181_p5, %p180_p4 }
   0xf   :  { %p183_p7 = pnand %p182_p6, %p176_p3 }
  0x11   :  { %186 = shalt.err (!%p183_p7)
}
  0x12   :  { %19 = dma.hbm_to_vmem [thread:$0]  %s303_s0, 128, %s17_s10, [#allocation3]  }
  0x13   :  { %s187_s25 = scalar_lea.hbm %s304_s1, 512 }
  0x14   :  { %p188_p8 = scmp.ne.s32.totalorder %s304_s1, %s187_s25  ;;  %p191_p9 = scmp.lt.u32.totalorder %s187_s25, %s304_s1 }
  0x16   :  { %p193_p10 = pnand %p191_p9, %p188_p8 }
  0x18   :  { %196 = shalt.err (!%p193_p10)
}
  0x19   :  { %s197_s30 = scalar_lea.vmem %s260_s12, 512  ;;  %p202_p12 = scmp.lt.s32.totalorder %s260_s12, %s260_s12 }
  0x1a   :  { %p198_p11 = scmp.ne.s32.totalorder %s260_s12, %s197_s30  ;;  %p203_p13 = scmp.lt.s32.totalorder %s197_s30, %s197_s30 }
  0x1c   :  { %p204_p0 = por %p203_p13, %p202_p12 }
  0x1e   :  { %p205_p1 = pnand %p204_p0, %p198_p11 }
  0x20   :  { %208 = shalt.err (!%p205_p1)
}
  0x21   :  { %s239_s0 = smov 128   ;;  %s240_s3 = smov 8  }
  0x22   :  { %31 = dma.hbm_to_vmem [thread:$0]  %s304_s1, 512, %s260_s12, [#allocation6], %s239_s0, %s239_s0, %s240_s3  }
  0x23   :  { %231 = dma.done.wait [#allocation3], 128  }
  0x24   :  { %232 = vsyncadd [#allocation3], 4294967168 }
  0x25   :  { %233 = dma.done.wait [#allocation6], 512  }
  0x26   :  { %234 = vsyncadd [#allocation6], 4294966784  ;;  %v241_v0 = vmov 0.0|0.0   ;;  %vm242_vm0 = vmmov 0   ;;  %v243_v1 = vmov 0.0   ;;  %v39_v2 = vld [vmem:[#allocation5] sm:$0xff] }
  0x27   :  { %151 = vmatprep.subr.bf16.mxu0 %v241_v0  ;;  %148 = vmatprep.mubr.msk.f32.mxu0 %vm242_vm0, %v243_v1  ;;  %v40_v3 = vld [vmem:[#allocation5 + $0x8] sm:$0xff]  ;;  %v41_v4 = vld [vmem:[#allocation5 + $0x10] sm:$0xff]  ;;  %v42_v6 = vld [vmem:[#allocation5 + $0x18] sm:$0xff]  ;;  %vm43_vm1 = vcmask 261120   ;;  %s244_s1 = smov [#allocation7]  }
  0x28   :  { %v152_v5 = vpack.c.bf16 %v40_v3, %v39_v2  ;;  %v155_v7 = vpack.c.bf16 %v42_v6, %v41_v4  ;;  %v38_v8 = vld [vmem:[#allocation2] sm:$0xff]  ;;  %s124_s6 = sshll.u32 %s244_s1, 4  ;;  %s125_s6 = int_to_ptr.vmem [resolvable:$true] %s124_s6 }
  0x29   :  { %s209_s7 = scalar_lea.vmem %s125_s6, 128  ;;  %p214_p3 = scmp.lt.s32.totalorder %s125_s6, %s125_s6 }
  0x2a   :  { %153 = vmatpush3.bf16.msra.mxu0 %v152_v5  ;;  %p210_p2 = scmp.ne.s32.totalorder %s125_s6, %s209_s7  ;;  %p215_p4 = scmp.lt.s32.totalorder %s209_s7, %s209_s7 }
  0x2b   :  { %154 = vmatprep.subr.bf16.mxu0 %v241_v0 }
  0x2c   :  { %p216_p5 = por %p215_p4, %p214_p3 }
  0x2e   :  { %156 = vmatpush3.bf16.msra.mxu0 %v155_v7  ;;  %p217_p6 = pnand %p216_p5, %p210_p2 }
  0x31   :  { %149 = vmatmul.mubr.msk.f32.vlgmr.msra.gmra.mrb[0].mxu0 %vm43_vm1, %v38_v8 }
 0x104   :  { %v113_v9 = vpop.f32.mrb[0].mxu0 }
 0x105   :  { %117 = vst [vmem:[#allocation7] sm:$0xff] %v113_v9  ;;  %v150_v10 = vpop.f32.mrb[1].mxu0 }
 0x106   :  { %220 = shalt.err (!%p217_p6)
}
 0x107   :  { %s221_s10 = scalar_lea.hbm %s305_s2, 128 }
 0x108   :  { %p222_p7 = scmp.ne.s32.totalorder %s305_s2, %s221_s10  ;;  %p225_p8 = scmp.lt.u32.totalorder %s221_s10, %s305_s2 }
 0x10a   :  { %p227_p9 = pnand %p225_p8, %p222_p7 }
 0x10c   :  { %230 = shalt.err (!%p227_p9)
}
 0x10d   :  { %127 = dma.vmem_to_hbm [thread:$0]  %s125_s6, 128, %s305_s2, [#allocation4]  }
 0x10e   :  { %235 = dma.done.wait [#allocation4], 128  }
 0x10f   :  { %236 = vsyncadd [#allocation4], 4294967168 }
 0x110   :  { %131 = vsyncpa [#allocation3], 1 }
 0x111   :  { %132 = vsyncpa [#allocation6], 1 }
 0x112   :  { %133 = vsyncpa [#allocation4], 1 }

</bundles_post_ra>
